<compile_context>
chip_gen: v6e
topology: v6e:2x2x1
jax: 0.10.0
libtpu: 0.0.40
codegen_flags: <defaults>
</compile_context>

<pallas_src>
import jax
import jax.numpy as jnp
from jax.experimental import pallas as pl
from jax.experimental.pallas import tpu as pltpu


def _sigmoid_kernel(x_ref, o_ref):
    # Single-vreg elementwise logistic (EUP path), whole tile at once.
    o_ref[...] = jax.nn.sigmoid(x_ref[...])


def sigmoid_pallas(x):
    """Apply sigmoid to an NCHW tensor using a single untiled Pallas TPU kernel."""
    orig_shape = x.shape
    # Lane-dense presentation: channels on the last (lane) axis. For [1, C, 1, 1] this
    # reshape is a pure metadata change.
    flat = x.reshape(1, -1)
    out = pl.pallas_call(
        _sigmoid_kernel,
        out_shape=jax.ShapeDtypeStruct(flat.shape, flat.dtype),
        # No grid: one untiled VMEM block in, one out.
        in_specs=[pl.BlockSpec(memory_space=pltpu.MemorySpace.VMEM)],
        out_specs=pl.BlockSpec(memory_space=pltpu.MemorySpace.VMEM),
    )(flat)
    return out.reshape(orig_shape)


if __name__ == "__main__":
    key = jax.random.PRNGKey(0)
    # Matches the module's input: torch.randn([1, 72, 1, 1])
    x15 = jax.random.normal(key, (1, 72, 1, 1), dtype=jnp.float32)

    y = sigmoid_pallas(x15)
    jax.block_until_ready(y)

    # sanity check against pure-JAX reference
    ref = jax.nn.sigmoid(x15)
    assert y.shape == x15.shape and y.dtype == x15.dtype
    assert jnp.allclose(y, ref, atol=1e-6), "mismatch vs reference sigmoid"

    print("KERNEL_OK")
</pallas_src>

<mosaic_0001>
module attributes {stable_mosaic.version = 11 : i64} {
  func.func @_sigmoid_kernel(%arg0: memref<1x72xf32, #tpu.memory_space<vmem>>, %arg1: memref<1x72xf32, #tpu.memory_space<vmem>>) attributes {dimension_semantics = [], scalar_prefetch = 0 : i64, scratch_operands = 0 : i64, tpu.core_type = #tpu.core_type<tc>} {
    %c0 = arith.constant 0 : index
    %c0_0 = arith.constant 0 : index
    %0 = vector.load %arg0[%c0, %c0_0] : memref<1x72xf32, #tpu.memory_space<vmem>>, vector<1x72xf32>
    %1 = arith.negf %0 : vector<1x72xf32>
    %2 = math.exp %1 : vector<1x72xf32>
    %cst = arith.constant 1.000000e+00 : f32
    %3 = vector.broadcast %cst : f32 to vector<1x72xf32>
    %4 = arith.addf %3, %2 : vector<1x72xf32>
    %5 = arith.divf %3, %4 : vector<1x72xf32>
    %c0_1 = arith.constant 0 : index
    %c0_2 = arith.constant 0 : index
    %6 = vector.load %arg1[%c0_1, %c0_2] : memref<1x72xf32, #tpu.memory_space<vmem>>, vector<1x72xf32>
    tpu.vector_store %arg1[%c0_1, %c0_2], %5 {strides = array<i32>} : memref<1x72xf32, #tpu.memory_space<vmem>>, vector<1x72xf32>,
    return
  }
}

</mosaic_0001>

<bundles_post_ra>
// kernel: tpu_custom_call.1
= control target key start
LH: loop header
LB: loop body
LE: loop exit
PB: predicated region body
PF: predicated region fallthrough
CT: control target
= control target key end

     0   :  { %6 = vsyncpa [#allocation3], 0  ;;  %s114_s0 = inlined_call_operand.hbm [shape: f32[1,72], index: 0, kind: input, shape index: {}]   ;;  %s115_s1 = inlined_call_operand.hbm [shape: f32[1,72], index: 1, kind: output, shape index: {}]  }
   0x1   :  { %7 = vsyncpa [#allocation4], 0  ;;  %s96_s6 = smov [#allocation2]  }
   0x2   :  { %s14_s7 = sshll.u32 %s96_s6, 4  ;;  %s15_s7 = int_to_ptr.vmem [resolvable:$true] %s14_s7 }
   0x3   :  { %s60_s8 = scalar_lea.vmem %s15_s7, 16  ;;  %s64_s9 = scalar_lea.vmem %s15_s7, 32 }
   0x4   :  { %p61_p0 = scmp.ne.s32.totalorder %s15_s7, %s60_s8  ;;  %p65_p1 = scmp.lt.s32.totalorder %s15_s7, %s15_s7 }
   0x5   :  { %p66_p2 = scmp.lt.s32.totalorder %s64_s9, %s60_s8 }
   0x7   :  { %p67_p3 = por %p66_p2, %p65_p1 }
   0x9   :  { %p68_p4 = pnand %p67_p3, %p61_p0 }
   0xb   :  { %71 = shalt.err (!%p68_p4)
}
   0xc   :  { %17 = dma.hbm_to_vmem [thread:$0]  %s114_s0, 16, %s15_s7, [#allocation3]  }
   0xd   :  { %92 = dma.done.wait [#allocation3], 16  }
   0xe   :  { %93 = vsyncadd [#allocation3], 4294967280  ;;  %v21_v0 = vld [vmem:[#allocation2] sm:$0x1]  ;;  %s97_s12 = smov [#allocation5]   ;;  %vm28_vm0 = vcmask 581632  }
   0xf   :  { %v45_v1 = vmul.f32 -1.442695, %v21_v0  ;;  %s36_s13 = sshll.u32 %s97_s12, 4  ;;  %s37_s13 = int_to_ptr.vmem [resolvable:$true] %s36_s13 }
  0x10   :  { %s72_s14 = scalar_lea.vmem %s37_s13, 16  ;;  %s76_s15 = scalar_lea.vmem %s37_s13, 32 }
  0x11   :  { %48 = vpow2.f32 %v45_v1  ;;  %p73_p5 = scmp.ne.s32.totalorder %s37_s13, %s72_s14  ;;  %p77_p6 = scmp.lt.s32.totalorder %s37_s13, %s37_s13 }
  0x12   :  { %p78_p7 = scmp.lt.s32.totalorder %s76_s15, %s72_s14 }
  0x14   :  { %p79_p8 = por %p78_p7, %p77_p6 }
  0x16   :  { %p80_p9 = pnand %p79_p8, %p73_p5 }
  0x1e   :  { %v49_v2 = vpop.eup %48 }
  0x1f   :  { %v25_v3 = vadd.f32 1.0, %v49_v2 }
  0x21   :  { %50 = vrcp.f32 %v25_v3 }
  0x2e   :  { %v51_v4 = vpop.eup %50 }
  0x2f   :  { %29 = vst.msk [vmem:[#allocation5] sm:$0x1] %vm28_vm0, %v51_v4 }
  0x30   :  { %83 = shalt.err (!%p80_p9)
}
  0x31   :  { %39 = dma.vmem_to_hbm [thread:$0]  %s37_s13, 16, %s115_s1, [#allocation4]  }
  0x32   :  { %94 = dma.done.wait [#allocation4], 16  }
  0x33   :  { %95 = vsyncadd [#allocation4], 4294967280 }
  0x34   :  { %43 = vsyncpa [#allocation3], 1 }
  0x35   :  { %44 = vsyncpa [#allocation4], 1 }

</bundles_post_ra>
